<compile_context>
chip_gen: v5e
topology: v5e:2x2
jax: 0.10.0
libtpu: 0.0.40
codegen_flags: <defaults>
</compile_context>

<pallas_src>
import functools
import numpy as np
import jax
import jax.numpy as jnp
from jax.experimental import pallas as pl
from jax.experimental.pallas import tpu as pltpu


# ----------------------------- Pallas kernel ------------------------------ #

def _mrgco_fused_kernel(a2_ref, x2_ref, w2_ref, ta_ref, th_ref, vout_ref, o_ref,
                        *, coeff, num_uniq, compute_dtype):
    """Fused MRGCO forward for one block of node rows.

    a2_ref  : (tm, M*R)  adjacency rows, relation axis merged into lanes
    x2_ref  : (M,  H*R)  node features
    w2_ref  : (H,  H*R)  weight
    ta_ref  : (RU, M*R, M)  DFT-fold (selection) matrices for A, per unique freq
    th_ref  : (RU, H*R, H)  DFT-fold matrices for X and for the weight
    vout_ref: (RU, H, H*R)  inverse-DFT + lane-dense output placement matrices
    o_ref   : (tm, H*R)  f32 output block
    """
    f32 = jnp.float32
    a2 = a2_ref[...]
    x2 = x2_ref[...]
    w2 = w2_ref[...]

    # Frequency-domain weight, pre-placed into the merged (h, (n, s)) output layout
    # and scaled by the inverse-DFT row:  WV[k'] = W_hat_{k'} @ Vout[k'].
    wv = []
    for kp in range(num_uniq):
        w_hat = jnp.dot(w2, th_ref[kp], preferred_element_type=f32)            # (H, H)
        wv.append(jnp.dot(w_hat.astype(compute_dtype), vout_ref[kp],
                          preferred_element_type=f32))                          # (H, H*R)

    acc = jnp.zeros(o_ref.shape, f32)
    for k in range(num_uniq):
        # DFT of this node-row block of A and of X at unique frequency k.
        a_hat = jnp.dot(a2, ta_ref[k], preferred_element_type=f32)              # (tm, M)
        x_hat = jnp.dot(x2, th_ref[k], preferred_element_type=f32)              # (M, H)
        # Per-frequency slice matmul of tensor product #1.
        c1 = jnp.dot(a_hat.astype(compute_dtype), x_hat.astype(compute_dtype),
                     preferred_element_type=f32)                                # (tm, H)
        # Fold (IDFT -> DFT) between the two products + Hermitian mirror multiplicities
        # into baked scalar coefficients; tensor product #2 and the final IDFT then
        # collapse into a single matmul against g.
        g = wv[0] * float(coeff[k, 0])
        for kp in range(1, num_uniq):
            g = g + wv[kp] * float(coeff[k, kp])
        acc = acc + jnp.dot(c1.astype(compute_dtype), g.astype(compute_dtype),
                            preferred_element_type=f32)                         # (tm, H*R)

    o_ref[...] = acc


# ----------------------- DFT-structure constants --------------------------- #

def _dft_structure(num_rel, num_nodes, hidden):
    """Real-DFT matrices and their 'selection' foldings (trace-time numpy constants)."""
    R = num_rel
    idx = np.arange(R)
    D = np.cos(2.0 * np.pi * (np.outer(idx, idx) % R) / R)   # real(fft) matrix, symmetric
    Dinv = D / R                                             # real(ifft) matrix
    RU = R // 2 + 1                                          # unique freqs (Hermitian sym.)
    mult = np.array([1.0 if (k == 0 or 2 * k == R) else 2.0 for k in range(RU)])
    P = Dinv @ D                                             # real(fft) o real(ifft)
    coeff = (mult[:, None] * mult[None, :] * P[:RU, :RU]).astype(np.float32)

    eyeM = np.eye(num_nodes)
    eyeH = np.eye(hidden)
    # TA[k, j*R + r, j'] = delta(j, j') * D[r, k]
    TA = np.einsum("rk,jJ->kjrJ", D[:, :RU], eyeM).reshape(RU, num_nodes * R, num_nodes)
    # TH[k, n*R + t, n'] = delta(n, n') * D[t, k]
    TH = np.einsum("tk,nN->kntN", D[:, :RU], eyeH).reshape(RU, hidden * R, hidden)
    # Vout[k, n, n'*R + s] = delta(n, n') * Dinv[k, s]
    Vout = np.einsum("ks,nN->knNs", Dinv[:RU, :], eyeH).reshape(RU, hidden, hidden * R)
    return RU, coeff, TA.astype(np.float32), TH.astype(np.float32), Vout.astype(np.float32)


# ------------------------------ MRGCO forward ------------------------------ #

def mrgco_forward(X, A, weight, *, use_bf16=False, node_block=None):
    """forward(X, A) = tensor_product(tensor_product(A, X), weight), fully fused."""
    M, H, R = X.shape
    assert A.shape == (M, M, R) and weight.shape == (H, H, R)
    RU, coeff, TA, TH, Vout = _dft_structure(R, M, H)

    in_dtype = jnp.bfloat16 if use_bf16 else jnp.float32
    # Free, metadata-only reshapes: relation axis merged into the lane dimension.
    a2 = A.reshape(M, M * R).astype(in_dtype)
    x2 = X.reshape(M, H * R).astype(in_dtype)
    w2 = weight.reshape(H, H * R).astype(in_dtype)
    ta = jnp.asarray(TA, dtype=in_dtype)
    th = jnp.asarray(TH, dtype=in_dtype)
    vo = jnp.asarray(Vout, dtype=in_dtype)

    tm = M if node_block is None else node_block
    assert M % tm == 0
    grid = (M // tm,)

    kernel = functools.partial(_mrgco_fused_kernel, coeff=coeff,
                               num_uniq=RU, compute_dtype=in_dtype)

    out2 = pl.pallas_call(
        kernel,
        out_shape=jax.ShapeDtypeStruct((M, H * R), jnp.float32),
        grid=grid,
        in_specs=[
            pl.BlockSpec((tm, M * R), lambda i: (i, 0)),         # A rows for this block
            pl.BlockSpec((M, H * R), lambda i: (0, 0)),          # X (resident)
            pl.BlockSpec((H, H * R), lambda i: (0, 0)),          # weight (resident)
            pl.BlockSpec((RU, M * R, M), lambda i: (0, 0, 0)),   # DFT fold for A
            pl.BlockSpec((RU, H * R, H), lambda i: (0, 0, 0)),   # DFT fold for X / weight
            pl.BlockSpec((RU, H, H * R), lambda i: (0, 0, 0)),   # IDFT + output placement
        ],
        out_specs=pl.BlockSpec((tm, H * R), lambda i: (i, 0)),   # lane-dense output
        compiler_params=pltpu.CompilerParams(
            dimension_semantics=("parallel",)),
    )(a2, x2, w2, ta, th, vo)

    return out2.reshape(M, H, R)


# ------------------------------ Pure-JAX ref -------------------------------- #

def _tensor_product_ref(A, B):
    n3 = A.shape[2]
    A_t = jnp.fft.fft(A, axis=-1)
    B_t = jnp.fft.fft(B, axis=-1)
    slices = [
        jnp.matmul(jnp.real(A_t[:, :, k]), jnp.real(B_t[:, :, k]))
        for k in range(n3)
    ]
    C_t = jnp.stack(slices, axis=-1)
    return jnp.real(jnp.fft.ifft(C_t, axis=-1))


def _mrgco_forward_ref(X, A, weight):
    res = _tensor_product_ref(A, X)
    return _tensor_product_ref(res, weight)


# --------------------------------- main ------------------------------------ #

if __name__ == "__main__":
    num_nodes, num_rel, hidden = 16, 4, 32

    key = jax.random.PRNGKey(0)
    k_a, k_x, k_w = jax.random.split(key, 3)

    A = jax.random.normal(k_a, (num_nodes, num_nodes, num_rel), dtype=jnp.float32)
    X = jax.random.normal(k_x, (num_nodes, hidden, num_rel), dtype=jnp.float32)
    weight = 0.01 * jax.random.normal(k_w, (hidden, hidden, num_rel), dtype=jnp.float32)

    ref = _mrgco_forward_ref(X, A, weight)

    # f32 path (v5e-safe), tight check against the FFT-based reference.
    out = jax.block_until_ready(jax.jit(mrgco_forward)(X, A, weight))
    assert out.shape == (num_nodes, hidden, num_rel)
    np.testing.assert_allclose(np.asarray(out), np.asarray(ref), rtol=1e-3, atol=1e-3)

    # bf16-operand path (v6e/v7x MXU-native), f32 accumulation; loose sanity check.
    out_bf16 = jax.block_until_ready(
        jax.jit(functools.partial(mrgco_forward, use_bf16=True))(X, A, weight))
    rel_err = float(
        np.linalg.norm(np.asarray(out_bf16) - np.asarray(ref))
        / np.linalg.norm(np.asarray(ref)))
    assert np.isfinite(rel_err) and rel_err < 0.2, f"bf16 path rel error {rel_err}"

    print("KERNEL_OK")
</pallas_src>

<mosaic_0001>
module attributes {stable_mosaic.version = 11 : i64} {
  func.func @_mrgco_fused_kernel(%arg0: i32, %arg1: memref<16x64xf32, #tpu.memory_space<vmem>>, %arg2: memref<16x128xf32, #tpu.memory_space<vmem>>, %arg3: memref<32x128xf32, #tpu.memory_space<vmem>>, %arg4: memref<3x64x16xf32, #tpu.memory_space<vmem>>, %arg5: memref<3x128x32xf32, #tpu.memory_space<vmem>>, %arg6: memref<3x32x128xf32, #tpu.memory_space<vmem>>, %arg7: memref<16x128xf32, #tpu.memory_space<vmem>>) attributes {dimension_semantics = [#tpu.dimension_semantics<parallel>], iteration_bounds = array<i64: 1>, scalar_prefetch = 0 : i64, scratch_operands = 0 : i64, tpu.core_type = #tpu.core_type<tc>, window_params = [{transform_indices = @transform_0, window_bounds = array<i64: 16, 64>}, {pipeline_mode = #tpu.pipeline_mode<synchronous>, transform_indices = @transform_1, window_bounds = array<i64: 16, 128>}, {pipeline_mode = #tpu.pipeline_mode<synchronous>, transform_indices = @transform_2, window_bounds = array<i64: 32, 128>}, {pipeline_mode = #tpu.pipeline_mode<synchronous>, transform_indices = @transform_3, window_bounds = array<i64: 3, 64, 16>}, {pipeline_mode = #tpu.pipeline_mode<synchronous>, transform_indices = @transform_4, window_bounds = array<i64: 3, 128, 32>}, {pipeline_mode = #tpu.pipeline_mode<synchronous>, transform_indices = @transform_5, window_bounds = array<i64: 3, 32, 128>}, {transform_indices = @transform_6, window_bounds = array<i64: 16, 128>}]} {
    %c0 = arith.constant 0 : index
    %c0_0 = arith.constant 0 : index
    %0 = vector.load %arg1[%c0, %c0_0] : memref<16x64xf32, #tpu.memory_space<vmem>>, vector<16x64xf32>
    %c0_1 = arith.constant 0 : index
    %c0_2 = arith.constant 0 : index
    %1 = vector.load %arg2[%c0_1, %c0_2] : memref<16x128xf32, #tpu.memory_space<vmem>>, vector<16x128xf32>
    %c0_3 = arith.constant 0 : index
    %c0_4 = arith.constant 0 : index
    %2 = vector.load %arg3[%c0_3, %c0_4] : memref<32x128xf32, #tpu.memory_space<vmem>>, vector<32x128xf32>
    %c0_5 = arith.constant 0 : index
    %c0_6 = arith.constant 0 : index
    %c0_7 = arith.constant 0 : index
    %3 = vector.load %arg5[%c0_5, %c0_6, %c0_7] : memref<3x128x32xf32, #tpu.memory_space<vmem>>, vector<1x128x32xf32>
    %4 = vector.shape_cast %3 : vector<1x128x32xf32> to vector<128x32xf32>
    %cst = arith.constant dense<0.000000e+00> : vector<32x32xf32>
    %5 = tpu.matmul %2, %4, %cst {dimension_numbers = #tpu.dot_dimension_numbers<[1], [0], [0], [1], [0, 0, 1, 1], [], []>} : vector<32x128xf32>, vector<128x32xf32>, vector<32x32xf32> -> vector<32x32xf32>
    %c0_8 = arith.constant 0 : index
    %c0_9 = arith.constant 0 : index
    %c0_10 = arith.constant 0 : index
    %6 = vector.load %arg6[%c0_8, %c0_9, %c0_10] : memref<3x32x128xf32, #tpu.memory_space<vmem>>, vector<1x32x128xf32>
    %7 = vector.shape_cast %6 : vector<1x32x128xf32> to vector<32x128xf32>
    %cst_11 = arith.constant dense<0.000000e+00> : vector<32x128xf32>
    %8 = tpu.matmul %5, %7, %cst_11 {dimension_numbers = #tpu.dot_dimension_numbers<[1], [0], [0], [1], [0, 0, 1, 1], [], []>} : vector<32x32xf32>, vector<32x128xf32>, vector<32x128xf32> -> vector<32x128xf32>
    %c1 = arith.constant 1 : index
    %c0_12 = arith.constant 0 : index
    %c0_13 = arith.constant 0 : index
    %9 = vector.load %arg5[%c1, %c0_12, %c0_13] : memref<3x128x32xf32, #tpu.memory_space<vmem>>, vector<1x128x32xf32>
    %10 = vector.shape_cast %9 : vector<1x128x32xf32> to vector<128x32xf32>
    %cst_14 = arith.constant dense<0.000000e+00> : vector<32x32xf32>
    %11 = tpu.matmul %2, %10, %cst_14 {dimension_numbers = #tpu.dot_dimension_numbers<[1], [0], [0], [1], [0, 0, 1, 1], [], []>} : vector<32x128xf32>, vector<128x32xf32>, vector<32x32xf32> -> vector<32x32xf32>
    %c1_15 = arith.constant 1 : index
    %c0_16 = arith.constant 0 : index
    %c0_17 = arith.constant 0 : index
    %12 = vector.load %arg6[%c1_15, %c0_16, %c0_17] : memref<3x32x128xf32, #tpu.memory_space<vmem>>, vector<1x32x128xf32>
    %13 = vector.shape_cast %12 : vector<1x32x128xf32> to vector<32x128xf32>
    %cst_18 = arith.constant dense<0.000000e+00> : vector<32x128xf32>
    %14 = tpu.matmul %11, %13, %cst_18 {dimension_numbers = #tpu.dot_dimension_numbers<[1], [0], [0], [1], [0, 0, 1, 1], [], []>} : vector<32x32xf32>, vector<32x128xf32>, vector<32x128xf32> -> vector<32x128xf32>
    %c2 = arith.constant 2 : index
    %c0_19 = arith.constant 0 : index
    %c0_20 = arith.constant 0 : index
    %15 = vector.load %arg5[%c2, %c0_19, %c0_20] : memref<3x128x32xf32, #tpu.memory_space<vmem>>, vector<1x128x32xf32>
    %16 = vector.shape_cast %15 : vector<1x128x32xf32> to vector<128x32xf32>
    %cst_21 = arith.constant dense<0.000000e+00> : vector<32x32xf32>
    %17 = tpu.matmul %2, %16, %cst_21 {dimension_numbers = #tpu.dot_dimension_numbers<[1], [0], [0], [1], [0, 0, 1, 1], [], []>} : vector<32x128xf32>, vector<128x32xf32>, vector<32x32xf32> -> vector<32x32xf32>
    %c2_22 = arith.constant 2 : index
    %c0_23 = arith.constant 0 : index
    %c0_24 = arith.constant 0 : index
    %18 = vector.load %arg6[%c2_22, %c0_23, %c0_24] : memref<3x32x128xf32, #tpu.memory_space<vmem>>, vector<1x32x128xf32>
    %19 = vector.shape_cast %18 : vector<1x32x128xf32> to vector<32x128xf32>
    %cst_25 = arith.constant dense<0.000000e+00> : vector<32x128xf32>
    %20 = tpu.matmul %17, %19, %cst_25 {dimension_numbers = #tpu.dot_dimension_numbers<[1], [0], [0], [1], [0, 0, 1, 1], [], []>} : vector<32x32xf32>, vector<32x128xf32>, vector<32x128xf32> -> vector<32x128xf32>
    %cst_26 = arith.constant 0.000000e+00 : f32
    %21 = vector.broadcast %cst_26 : f32 to vector<16x128xf32>
    %c0_27 = arith.constant 0 : index
    %c0_28 = arith.constant 0 : index
    %c0_29 = arith.constant 0 : index
    %22 = vector.load %arg4[%c0_27, %c0_28, %c0_29] : memref<3x64x16xf32, #tpu.memory_space<vmem>>, vector<1x64x16xf32>
    %23 = vector.shape_cast %22 : vector<1x64x16xf32> to vector<64x16xf32>
    %cst_30 = arith.constant dense<0.000000e+00> : vector<16x16xf32>
    %24 = tpu.matmul %0, %23, %cst_30 {dimension_numbers = #tpu.dot_dimension_numbers<[1], [0], [0], [1], [0, 0, 1, 1], [], []>} : vector<16x64xf32>, vector<64x16xf32>, vector<16x16xf32> -> vector<16x16xf32>
    %c0_31 = arith.constant 0 : index
    %c0_32 = arith.constant 0 : index
    %c0_33 = arith.constant 0 : index
    %25 = vector.load %arg5[%c0_31, %c0_32, %c0_33] : memref<3x128x32xf32, #tpu.memory_space<vmem>>, vector<1x128x32xf32>
    %26 = vector.shape_cast %25 : vector<1x128x32xf32> to vector<128x32xf32>
    %cst_34 = arith.constant dense<0.000000e+00> : vector<16x32xf32>
    %27 = tpu.matmul %1, %26, %cst_34 {dimension_numbers = #tpu.dot_dimension_numbers<[1], [0], [0], [1], [0, 0, 1, 1], [], []>} : vector<16x128xf32>, vector<128x32xf32>, vector<16x32xf32> -> vector<16x32xf32>
    %cst_35 = arith.constant dense<0.000000e+00> : vector<16x32xf32>
    %28 = tpu.matmul %24, %27, %cst_35 {dimension_numbers = #tpu.dot_dimension_numbers<[1], [0], [0], [1], [0, 0, 1, 1], [], []>} : vector<16x16xf32>, vector<16x32xf32>, vector<16x32xf32> -> vector<16x32xf32>
    %cst_36 = arith.constant 1.000000e+00 : f32
    %29 = vector.broadcast %cst_36 : f32 to vector<32x128xf32>
    %30 = arith.mulf %8, %29 : vector<32x128xf32>
    %cst_37 = arith.constant -9.18485073E-17 : f32
    %31 = vector.broadcast %cst_37 : f32 to vector<32x128xf32>
    %32 = arith.mulf %14, %31 : vector<32x128xf32>
    %33 = arith.addf %30, %32 : vector<32x128xf32>
    %cst_38 = arith.constant 0.000000e+00 : f32
    %34 = vector.broadcast %cst_38 : f32 to vector<32x128xf32>
    %35 = arith.mulf %20, %34 : vector<32x128xf32>
    %36 = arith.addf %33, %35 : vector<32x128xf32>
    %cst_39 = arith.constant dense<0.000000e+00> : vector<16x128xf32>
    %37 = tpu.matmul %28, %36, %cst_39 {dimension_numbers = #tpu.dot_dimension_numbers<[1], [0], [0], [1], [0, 0, 1, 1], [], []>} : vector<16x32xf32>, vector<32x128xf32>, vector<16x128xf32> -> vector<16x128xf32>
    %38 = arith.addf %21, %37 : vector<16x128xf32>
    %c1_40 = arith.constant 1 : index
    %c0_41 = arith.constant 0 : index
    %c0_42 = arith.constant 0 : index
    %39 = vector.load %arg4[%c1_40, %c0_41, %c0_42] : memref<3x64x16xf32, #tpu.memory_space<vmem>>, vector<1x64x16xf32>
    %40 = vector.shape_cast %39 : vector<1x64x16xf32> to vector<64x16xf32>
    %cst_43 = arith.constant dense<0.000000e+00> : vector<16x16xf32>
    %41 = tpu.matmul %0, %40, %cst_43 {dimension_numbers = #tpu.dot_dimension_numbers<[1], [0], [0], [1], [0, 0, 1, 1], [], []>} : vector<16x64xf32>, vector<64x16xf32>, vector<16x16xf32> -> vector<16x16xf32>
    %c1_44 = arith.constant 1 : index
    %c0_45 = arith.constant 0 : index
    %c0_46 = arith.constant 0 : index
    %42 = vector.load %arg5[%c1_44, %c0_45, %c0_46] : memref<3x128x32xf32, #tpu.memory_space<vmem>>, vector<1x128x32xf32>
    %43 = vector.shape_cast %42 : vector<1x128x32xf32> to vector<128x32xf32>
    %cst_47 = arith.constant dense<0.000000e+00> : vector<16x32xf32>
    %44 = tpu.matmul %1, %43, %cst_47 {dimension_numbers = #tpu.dot_dimension_numbers<[1], [0], [0], [1], [0, 0, 1, 1], [], []>} : vector<16x128xf32>, vector<128x32xf32>, vector<16x32xf32> -> vector<16x32xf32>
    %cst_48 = arith.constant dense<0.000000e+00> : vector<16x32xf32>
    %45 = tpu.matmul %41, %44, %cst_48 {dimension_numbers = #tpu.dot_dimension_numbers<[1], [0], [0], [1], [0, 0, 1, 1], [], []>} : vector<16x16xf32>, vector<16x32xf32>, vector<16x32xf32> -> vector<16x32xf32>
    %cst_49 = arith.constant -9.18485073E-17 : f32
    %46 = vector.broadcast %cst_49 : f32 to vector<32x128xf32>
    %47 = arith.mulf %8, %46 : vector<32x128xf32>
    %cst_50 = arith.constant 2.000000e+00 : f32
    %48 = vector.broadcast %cst_50 : f32 to vector<32x128xf32>
    %49 = arith.mulf %14, %48 : vector<32x128xf32>
    %50 = arith.addf %47, %49 : vector<32x128xf32>
    %cst_51 = arith.constant 3.63373594E-17 : f32
    %51 = vector.broadcast %cst_51 : f32 to vector<32x128xf32>
    %52 = arith.mulf %20, %51 : vector<32x128xf32>
    %53 = arith.addf %50, %52 : vector<32x128xf32>
    %cst_52 = arith.constant dense<0.000000e+00> : vector<16x128xf32>
    %54 = tpu.matmul %45, %53, %cst_52 {dimension_numbers = #tpu.dot_dimension_numbers<[1], [0], [0], [1], [0, 0, 1, 1], [], []>} : vector<16x32xf32>, vector<32x128xf32>, vector<16x128xf32> -> vector<16x128xf32>
    %55 = arith.addf %38, %54 : vector<16x128xf32>
    %c2_53 = arith.constant 2 : index
    %c0_54 = arith.constant 0 : index
    %c0_55 = arith.constant 0 : index
    %56 = vector.load %arg4[%c2_53, %c0_54, %c0_55] : memref<3x64x16xf32, #tpu.memory_space<vmem>>, vector<1x64x16xf32>
    %57 = vector.shape_cast %56 : vector<1x64x16xf32> to vector<64x16xf32>
    %cst_56 = arith.constant dense<0.000000e+00> : vector<16x16xf32>
    %58 = tpu.matmul %0, %57, %cst_56 {dimension_numbers = #tpu.dot_dimension_numbers<[1], [0], [0], [1], [0, 0, 1, 1], [], []>} : vector<16x64xf32>, vector<64x16xf32>, vector<16x16xf32> -> vector<16x16xf32>
    %c2_57 = arith.constant 2 : index
    %c0_58 = arith.constant 0 : index
    %c0_59 = arith.constant 0 : index
    %59 = vector.load %arg5[%c2_57, %c0_58, %c0_59] : memref<3x128x32xf32, #tpu.memory_space<vmem>>, vector<1x128x32xf32>
    %60 = vector.shape_cast %59 : vector<1x128x32xf32> to vector<128x32xf32>
    %cst_60 = arith.constant dense<0.000000e+00> : vector<16x32xf32>
    %61 = tpu.matmul %1, %60, %cst_60 {dimension_numbers = #tpu.dot_dimension_numbers<[1], [0], [0], [1], [0, 0, 1, 1], [], []>} : vector<16x128xf32>, vector<128x32xf32>, vector<16x32xf32> -> vector<16x32xf32>
    %cst_61 = arith.constant dense<0.000000e+00> : vector<16x32xf32>
    %62 = tpu.matmul %58, %61, %cst_61 {dimension_numbers = #tpu.dot_dimension_numbers<[1], [0], [0], [1], [0, 0, 1, 1], [], []>} : vector<16x16xf32>, vector<16x32xf32>, vector<16x32xf32> -> vector<16x32xf32>
    %cst_62 = arith.constant 0.000000e+00 : f32
    %63 = vector.broadcast %cst_62 : f32 to vector<32x128xf32>
    %64 = arith.mulf %8, %63 : vector<32x128xf32>
    %cst_63 = arith.constant 3.63373594E-17 : f32
    %65 = vector.broadcast %cst_63 : f32 to vector<32x128xf32>
    %66 = arith.mulf %14, %65 : vector<32x128xf32>
    %67 = arith.addf %64, %66 : vector<32x128xf32>
    %cst_64 = arith.constant 1.000000e+00 : f32
    %68 = vector.broadcast %cst_64 : f32 to vector<32x128xf32>
    %69 = arith.mulf %20, %68 : vector<32x128xf32>
    %70 = arith.addf %67, %69 : vector<32x128xf32>
    %cst_65 = arith.constant dense<0.000000e+00> : vector<16x128xf32>
    %71 = tpu.matmul %62, %70, %cst_65 {dimension_numbers = #tpu.dot_dimension_numbers<[1], [0], [0], [1], [0, 0, 1, 1], [], []>} : vector<16x32xf32>, vector<32x128xf32>, vector<16x128xf32> -> vector<16x128xf32>
    %72 = arith.addf %55, %71 : vector<16x128xf32>
    %c0_66 = arith.constant 0 : index
    %c0_67 = arith.constant 0 : index
    %73 = vector.load %arg7[%c0_66, %c0_67] : memref<16x128xf32, #tpu.memory_space<vmem>>, vector<16x128xf32>
    tpu.vector_store %arg7[%c0_66, %c0_67], %72 {strides = array<i32>} : memref<16x128xf32, #tpu.memory_space<vmem>>, vector<16x128xf32>,
    return
  }
  func.func @transform_0(%arg0: i32) -> (i32, i32) {
    %c0_i32 = arith.constant 0 : i32
    %c0_i32_0 = arith.constant 0 : i32
    return %arg0, %c0_i32 : i32, i32
  }
  func.func @transform_1(%arg0: i32) -> (i32, i32) {
    %c0_i32 = arith.constant 0 : i32
    %c0_i32_0 = arith.constant 0 : i32
    %c0_i32_1 = arith.constant 0 : i32
    return %c0_i32, %c0_i32_0 : i32, i32
  }
  func.func @transform_2(%arg0: i32) -> (i32, i32) {
    %c0_i32 = arith.constant 0 : i32
    %c0_i32_0 = arith.constant 0 : i32
    %c0_i32_1 = arith.constant 0 : i32
    return %c0_i32, %c0_i32_0 : i32, i32
  }
  func.func @transform_3(%arg0: i32) -> (i32, i32, i32) {
    %c0_i32 = arith.constant 0 : i32
    %c0_i32_0 = arith.constant 0 : i32
    %c0_i32_1 = arith.constant 0 : i32
    %c0_i32_2 = arith.constant 0 : i32
    return %c0_i32, %c0_i32_0, %c0_i32_1 : i32, i32, i32
  }
  func.func @transform_4(%arg0: i32) -> (i32, i32, i32) {
    %c0_i32 = arith.constant 0 : i32
    %c0_i32_0 = arith.constant 0 : i32
    %c0_i32_1 = arith.constant 0 : i32
    %c0_i32_2 = arith.constant 0 : i32
    return %c0_i32, %c0_i32_0, %c0_i32_1 : i32, i32, i32
  }
  func.func @transform_5(%arg0: i32) -> (i32, i32, i32) {
    %c0_i32 = arith.constant 0 : i32
    %c0_i32_0 = arith.constant 0 : i32
    %c0_i32_1 = arith.constant 0 : i32
    %c0_i32_2 = arith.constant 0 : i32
    return %c0_i32, %c0_i32_0, %c0_i32_1 : i32, i32, i32
  }
  func.func @transform_6(%arg0: i32) -> (i32, i32) {
    %c0_i32 = arith.constant 0 : i32
    %c0_i32_0 = arith.constant 0 : i32
    return %arg0, %c0_i32 : i32, i32
  }
}

</mosaic_0001>

<bundles_post_ra>
// kernel: mrgco_forward.1
= control target key start
LH: loop header
LB: loop body
LE: loop exit
PB: predicated region body
PF: predicated region fallthrough
CT: control target
= control target key end

     0   :  { %vm80_vm0 = vcmask 261120   ;;  %vm314_vm1 = vcmask 523264   ;;  %vm367_vm2 = vcmask 130048   ;;  %s1397_s4 = inlined_call_operand.vmem [shape: f32[3,128,32], index: 4, kind: input, shape index: {}]   ;;  %s1398_s5 = inlined_call_operand.vmem [shape: f32[3,32,128], index: 5, kind: input, shape index: {}]   ;;  %s1399_s2 = inlined_call_operand.vmem [shape: f32[32,128], index: 2, kind: input, shape index: {}]   ;;  %s1400_s3 = inlined_call_operand.vmem [shape: f32[3,64,16], index: 3, kind: input, shape index: {}]   ;;  %s1401_s1 = inlined_call_operand.vmem [shape: f32[16,128], index: 1, kind: input, shape index: {}]   ;;  %s1402_s0 = inlined_call_operand.vmem [shape: f32[16,64], index: 0, kind: input, shape index: {}]   ;;  %s1403_s6 = inlined_call_operand.vmem [shape: f32[16,128], index: 6, kind: output, shape index: {}]  }
   0x1   :  { %v836_v0 = vld [vmem:[%s1397_s4 + $0x78] sm:$0xff]  ;;  %v841_v1 = vld [vmem:[%s1397_s4 + $0x70] sm:$0xff]  ;;  %v847_v2 = vld [vmem:[%s1397_s4 + $0x68] sm:$0xff] }
   0x2   :  { %47 = vmatpush.msra.mxu0 %v836_v0  ;;  %v853_v3 = vld [vmem:[%s1397_s4 + $0x60] sm:$0xff]  ;;  %v859_v4 = vld [vmem:[%s1397_s4 + $0x58] sm:$0xff]  ;;  %v865_v5 = vld [vmem:[%s1397_s4 + $0x50] sm:$0xff] }
   0x3   :  { %v871_v6 = vld [vmem:[%s1397_s4 + $0x48] sm:$0xff]  ;;  %v877_v7 = vld [vmem:[%s1397_s4 + $0x40] sm:$0xff]  ;;  %v883_v8 = vld [vmem:[%s1397_s4 + $0x38] sm:$0xff] }
   0x4   :  { %48 = vmatpush.msra.mxu0 %v841_v1  ;;  %v889_v9 = vld [vmem:[%s1397_s4 + $0x30] sm:$0xff]  ;;  %v895_v10 = vld [vmem:[%s1397_s4 + $0x28] sm:$0xff]  ;;  %v901_v11 = vld [vmem:[%s1397_s4 + $0x20] sm:$0xff] }
   0x5   :  { %v907_v12 = vld [vmem:[%s1397_s4 + $0x18] sm:$0xff]  ;;  %v913_v13 = vld [vmem:[%s1397_s4 + $0x10] sm:$0xff]  ;;  %v925_v16 = vld [vmem:[%s1397_s4 + $0x8] sm:$0xff] }
   0x6   :  { %49 = vmatpush.msra.mxu0 %v847_v2  ;;  %v79_v14 = vld [vmem:[%s1398_s5 + $0x18] sm:$0xff]  ;;  %v78_v15 = vld [vmem:[%s1398_s5 + $0x10] sm:$0xff]  ;;  %v77_v17 = vld [vmem:[%s1398_s5 + $0x8] sm:$0xff] }
   0x7   :  { %105 = vmatpush.msra.mxu2 %v79_v14  ;;  %v934_v18 = vld [vmem:[%s1397_s4] sm:$0xff]  ;;  %v947_v20 = vld [vmem:[%s1399_s2 + $0x8] sm:$0xff]  ;;  %v953_v21 = vld [vmem:[%s1399_s2 + $0x10] sm:$0xff] }
   0x8   :  { %50 = vmatpush.msra.mxu0 %v853_v3  ;;  %v940_v19 = vld [vmem:[%s1399_s2] sm:$0xff]  ;;  %v959_v22 = vld [vmem:[%s1399_s2 + $0x18] sm:$0xff]  ;;  %v973_v25 = vld [vmem:[%s1397_s4 + $0xf0] sm:$0xff] }
   0x9   :  { %106 = vmatpush.msra.mxu2 %v78_v15  ;;  %v76_v23 = vld [vmem:[%s1398_s5] sm:$0xff]  ;;  %v968_v24 = vld [vmem:[%s1397_s4 + $0xf8] sm:$0xff]  ;;  %v979_v26 = vld [vmem:[%s1397_s4 + $0xe8] sm:$0xff] }
   0xa   :  { %51 = vmatpush.msra.mxu0 %v859_v4  ;;  %v986_v27 = vld [vmem:[%s1397_s4 + $0xe0] sm:$0xff]  ;;  %v992_v28 = vld [vmem:[%s1397_s4 + $0xd8] sm:$0xff]  ;;  %v997_v29 = vld [vmem:[%s1397_s4 + $0xd0] sm:$0xff] }
   0xb   :  { %107 = vmatpush.msra.mxu2 %v77_v17  ;;  %v1003_v30 = vld [vmem:[%s1397_s4 + $0xc8] sm:$0xff]  ;;  %v1010_v31 = vld [vmem:[%s1397_s4 + $0xc0] sm:$0xff]  ;;  %v1016_v32 = vld [vmem:[%s1397_s4 + $0xb8] sm:$0xff] }
   0xc   :  { %52 = vmatpush.msra.mxu0 %v865_v5  ;;  %v1021_v33 = vld [vmem:[%s1397_s4 + $0xb0] sm:$0xff]  ;;  %v1027_v34 = vld [vmem:[%s1397_s4 + $0xa8] sm:$0xff]  ;;  %v1034_v35 = vld [vmem:[%s1397_s4 + $0xa0] sm:$0xff] }
   0xd   :  { %108 = vmatpush.msra.mxu2 %v76_v23  ;;  %v1040_v36 = vld [vmem:[%s1397_s4 + $0x98] sm:$0xff]  ;;  %v1045_v37 = vld [vmem:[%s1397_s4 + $0x90] sm:$0xff]  ;;  %v1051_v38 = vld [vmem:[%s1397_s4 + $0x88] sm:$0xff] }
   0xe   :  { %53 = vmatpush.msra.mxu0 %v871_v6  ;;  %v1057_v39 = vld [vmem:[%s1397_s4 + $0x80] sm:$0xff]  ;;  %v1065_v41 = vld [vmem:[%s1397_s4 + $0x178] sm:$0xff]  ;;  %v1076_v43 = vld [vmem:[%s1397_s4 + $0x170] sm:$0xff] }
   0xf   :  { %139 = vmatpush.msrb.mxu2 %v968_v24  ;;  %231 = vmatpush.msra.mxu1 %v1065_v41  ;;  %v1081_v44 = vld [vmem:[%s1397_s4 + $0x168] sm:$0xff]  ;;  %v1088_v45 = vld [vmem:[%s1397_s4 + $0x160] sm:$0xff]  ;;  %v1095_v46 = vld [vmem:[%s1397_s4 + $0x158] sm:$0xff] }
  0x10   :  { %54 = vmatpush.msra.mxu0 %v877_v7  ;;  %v1105_v48 = vld [vmem:[%s1397_s4 + $0x150] sm:$0xff]  ;;  %v1110_v49 = vld [vmem:[%s1397_s4 + $0x148] sm:$0xff]  ;;  %v1117_v50 = vld [vmem:[%s1397_s4 + $0x140] sm:$0xff] }
  0x11   :  { %140 = vmatpush.msrb.mxu2 %v973_v25  ;;  %232 = vmatpush.msra.mxu1 %v1076_v43  ;;  %v1124_v51 = vld [vmem:[%s1397_s4 + $0x138] sm:$0xff]  ;;  %v1134_v53 = vld [vmem:[%s1397_s4 + $0x130] sm:$0xff]  ;;  %v1139_v54 = vld [vmem:[%s1397_s4 + $0x128] sm:$0xff] }
  0x12   :  { %55 = vmatpush.msra.mxu0 %v883_v8  ;;  %v1146_v55 = vld [vmem:[%s1397_s4 + $0x120] sm:$0xff]  ;;  %v1153_v56 = vld [vmem:[%s1397_s4 + $0x118] sm:$0xff]  ;;  %v1160_v57 = vld [vmem:[%s1397_s4 + $0x110] sm:$0xff] }
  0x13   :  { %141 = vmatpush.msrb.mxu2 %v979_v26  ;;  %233 = vmatpush.msra.mxu1 %v1081_v44  ;;  %v1168_v58 = vld [vmem:[%s1397_s4 + $0x108] sm:$0xff]  ;;  %v1174_v59 = vld [vmem:[%s1397_s4 + $0x100] sm:$0xff]  ;;  %v735_v60 = vld [vmem:[%s1398_s5 + $0x38] sm:$0xff] }
  0x14   :  { %56 = vmatpush.msra.mxu0 %v889_v9  ;;  %v734_v61 = vld [vmem:[%s1398_s5 + $0x30] sm:$0xff]  ;;  %197 = vmatpush.msra.mxu3 %v735_v60  ;;  %v733_v62 = vld [vmem:[%s1398_s5 + $0x28] sm:$0xff]  ;;  %v732_v63 = vld [vmem:[%s1398_s5 + $0x20] sm:$0xff] }
  0x15   :  { %142 = vmatpush.msrb.mxu2 %v986_v27  ;;  %234 = vmatpush.msra.mxu1 %v1088_v45  ;;  %v1242_v14 = vld [vmem:[%s1401_s1] sm:$0xff]  ;;  %v757_v15 = vld [vmem:[%s1398_s5 + $0x48] sm:$0xff] }
  0x16   :  { %57 = vmatpush.msra.mxu0 %v895_v10  ;;  %198 = vmatpush.msra.mxu3 %v734_v61 }
  0x17   :  { %143 = vmatpush.msrb.mxu2 %v992_v28  ;;  %235 = vmatpush.msra.mxu1 %v1095_v46 }
  0x18   :  { %58 = vmatpush.msra.mxu0 %v901_v11  ;;  %199 = vmatpush.msra.mxu3 %v733_v62 }
  0x19   :  { %144 = vmatpush.msrb.mxu2 %v997_v29  ;;  %236 = vmatpush.msra.mxu1 %v1105_v48 }
  0x1a   :  { %59 = vmatpush.msra.mxu0 %v907_v12  ;;  %200 = vmatpush.msra.mxu3 %v732_v63 }
  0x1b   :  { %145 = vmatpush.msrb.mxu2 %v1003_v30  ;;  %237 = vmatpush.msra.mxu1 %v1110_v49 }
  0x1c   :  { %60 = vmatpush.msra.mxu0 %v913_v13 }
  0x1d   :  { %146 = vmatpush.msrb.mxu2 %v1010_v31  ;;  %238 = vmatpush.msra.mxu1 %v1117_v50 }
  0x1e   :  { %61 = vmatpush.msra.mxu0 %v925_v16 }
  0x1f   :  { %147 = vmatpush.msrb.mxu2 %v1016_v32  ;;  %239 = vmatpush.msra.mxu1 %v1124_v51 }
  0x20   :  { %62 = vmatpush.msra.mxu0 %v934_v18 }
  0x21   :  { %63 = vmatmul.f32.vlgmr.msra.gmra.mxu0 %v940_v19  ;;  %148 = vmatpush.msrb.mxu2 %v1021_v33 }
  0x22   :  { %240 = vmatpush.msra.mxu1 %v1134_v53 }
  0x23   :  { %149 = vmatpush.msrb.mxu2 %v1027_v34 }
  0x24   :  { %241 = vmatpush.msra.mxu1 %v1139_v54 }
  0x25   :  { %150 = vmatpush.msrb.mxu2 %v1034_v35 }
  0x26   :  { %242 = vmatpush.msra.mxu1 %v1146_v55 }
  0x27   :  { %151 = vmatpush.msrb.mxu2 %v1040_v36 }
  0x28   :  { %243 = vmatpush.msra.mxu1 %v1153_v56 }
  0x29   :  { %66 = vmatmul.f32.gmra.mxu0 %v947_v20  ;;  %152 = vmatpush.msrb.mxu2 %v1045_v37 }
  0x2a   :  { %244 = vmatpush.msra.mxu1 %v1160_v57 }
  0x2b   :  { %153 = vmatpush.msrb.mxu2 %v1051_v38 }
  0x2c   :  { %245 = vmatpush.msra.mxu1 %v1168_v58 }
  0x2d   :  { %154 = vmatpush.msrb.mxu2 %v1057_v39 }
  0x2e   :  { %246 = vmatpush.msra.mxu1 %v1174_v59 }
  0x2f   :  { %247 = vmatmul.f32.vlgmr.msra.gmra.mxu1 %v940_v19 }
  0x31   :  { %69 = vmatmul.f32.gmra.mxu0 %v953_v21 }
  0x37   :  { %250 = vmatmul.f32.gmra.mxu1 %v947_v20 }
  0x39   :  { %72 = vmatmul.f32.gmra.mxu0 %v959_v22 }
  0x3f   :  { %253 = vmatmul.f32.gmra.mxu1 %v953_v21 }
  0x47   :  { %256 = vmatmul.f32.gmra.mxu1 %v959_v22 }
  0x9e   :  { %v64_v40 = vpop.f32.mrf.mxu0 }
  0x9f   :  { %712 = vmatmul.msk.f32.vlgmr.msra.gmra.mxu2 %vm80_vm0, %v64_v40 }
  0xa0   :  { %344 = vmatpush.msra.mxu2 %v836_v0 }
  0xa2   :  { %345 = vmatpush.msra.mxu2 %v841_v1  ;;  %v313_v1 = vld [vmem:[%s1400_s3 + $0x38] sm:$0xff] }
  0xa3   :  { %329 = vmatpush.msrb.mxu0 %v313_v1 }
  0xa4   :  { %346 = vmatpush.msra.mxu2 %v847_v2  ;;  %v312_v2 = vld [vmem:[%s1400_s3 + $0x30] sm:$0xff] }
  0xa5   :  { %330 = vmatpush.msrb.mxu0 %v312_v2 }
  0xa6   :  { %v67_v42 = vpop.f32.mrf.mxu0  ;;  %347 = vmatpush.msra.mxu2 %v853_v3  ;;  %v311_v3 = vld [vmem:[%s1400_s3 + $0x28] sm:$0xff] }
  0xa7   :  { %713 = vmatmul.msk.f32.gmra.mxu2 %vm80_vm0, %v67_v42  ;;  %331 = vmatpush.msrb.mxu0 %v311_v3 }
  0xa8   :  { %348 = vmatpush.msra.mxu2 %v859_v4 }
  0xaa   :  { %349 = vmatpush.msra.mxu2 %v865_v5  ;;  %v310_v5 = vld [vmem:[%s1400_s3 + $0x20] sm:$0xff] }
  0xab   :  { %332 = vmatpush.msrb.mxu0 %v310_v5 }
  0xac   :  { %350 = vmatpush.msra.mxu2 %v871_v6  ;;  %v309_v6 = vld [vmem:[%s1400_s3 + $0x18] sm:$0xff] }
  0xad   :  { %333 = vmatpush.msrb.mxu0 %v309_v6 }
  0xae   :  { %v70_v47 = vpop.f32.mrf.mxu0  ;;  %351 = vmatpush.msra.mxu2 %v877_v7  ;;  %v759_v7 = vld [vmem:[%s1398_s5 + $0x58] sm:$0xff] }
  0xaf   :  { %714 = vmatmul.msk.f32.gmra.mxu2 %vm80_vm0, %v70_v47  ;;  %289 = vmatpush.msrb.mxu3 %v759_v7 }
  0xb0   :  { %352 = vmatpush.msra.mxu2 %v883_v8  ;;  %v308_v8 = vld [vmem:[%s1400_s3 + $0x10] sm:$0xff] }
  0xb1   :  { %334 = vmatpush.msrb.mxu0 %v308_v8 }
  0xb2   :  { %353 = vmatpush.msra.mxu2 %v889_v9  ;;  %v307_v9 = vld [vmem:[%s1400_s3 + $0x8] sm:$0xff] }
  0xb3   :  { %335 = vmatpush.msrb.mxu0 %v307_v9 }
  0xb4   :  { %354 = vmatpush.msra.mxu2 %v895_v10 }
  0xb6   :  { %v73_v52 = vpop.f32.mrf.mxu0  ;;  %355 = vmatpush.msra.mxu2 %v901_v11  ;;  %v306_v11 = vld [vmem:[%s1400_s3] sm:$0xff] }
  0xb7   :  { %715 = vmatmul.msk.f32.gmra.mxu2 %vm80_vm0, %v73_v52  ;;  %336 = vmatpush.msrb.mxu0 %v306_v11 }
  0xb8   :  { %356 = vmatpush.msra.mxu2 %v907_v12  ;;  %v758_v12 = vld [vmem:[%s1398_s5 + $0x50] sm:$0xff] }
  0xb9   :  { %290 = vmatpush.msrb.mxu3 %v758_v12  ;;  %445 = vmatpush.msra.mxu0 %v968_v24  ;;  %v774_v24 = vld [vmem:[%s1400_s3 + $0x70] sm:$0xff] }
  0xba   :  { %357 = vmatpush.msra.mxu2 %v913_v13 }
  0xbb   :  { %446 = vmatpush.msra.mxu0 %v973_v25  ;;  %291 = vmatpush.msrb.mxu3 %v757_v15  ;;  %v773_v25 = vld [vmem:[%s1400_s3 + $0x68] sm:$0xff] }
  0xbc   :  { %358 = vmatpush.msra.mxu2 %v925_v16  ;;  %v756_v16 = vld [vmem:[%s1398_s5 + $0x40] sm:$0xff] }
  0xbd   :  { %447 = vmatpush.msra.mxu0 %v979_v26  ;;  %292 = vmatpush.msrb.mxu3 %v756_v16  ;;  %v772_v26 = vld [vmem:[%s1400_s3 + $0x60] sm:$0xff] }
  0xbe   :  { %359 = vmatpush.msra.mxu2 %v934_v18  ;;  %v1259_v18 = vld [vmem:[%s1402_s0] sm:$0xff] }
  0xbf   :  { %155 = vmatmul.f32.vlgmr.msrb.gmra.mxu2 %v940_v19  ;;  %448 = vmatpush.msra.mxu0 %v986_v27  ;;  %v1264_v19 = vld [vmem:[%s1401_s1 + $0x8] sm:$0xff] }
  0xc0   :  { %764 = vmatmul.msk.f32.vlgmr.msrb.gmra.mxu0 %vm314_vm1, %v1259_v18 }
  0xc1   :  { %449 = vmatpush.msra.mxu0 %v992_v28  ;;  %v248_v28 = vpop.f32.mrf.mxu1 }
  0xc3   :  { %450 = vmatpush.msra.mxu0 %v997_v29  ;;  %v771_v29 = vld [vmem:[%s1400_s3 + $0x58] sm:$0xff] }
  0xc5   :  { %451 = vmatpush.msra.mxu0 %v1003_v30  ;;  %v770_v30 = vld [vmem:[%s1400_s3 + $0x50] sm:$0xff] }
  0xc7   :  { %158 = vmatmul.f32.gmra.mxu2 %v947_v20  ;;  %452 = vmatpush.msra.mxu0 %v1010_v31  ;;  %v769_v31 = vld [vmem:[%s1400_s3 + $0x48] sm:$0xff] }
  0xc9   :  { %453 = vmatpush.msra.mxu0 %v1016_v32  ;;  %v768_v32 = vld [vmem:[%s1400_s3 + $0x40] sm:$0xff] }
  0xcb   :  { %454 = vmatpush.msra.mxu0 %v1021_v33  ;;  %v251_v33 = vpop.f32.mrf.mxu1 }
  0xcd   :  { %455 = vmatpush.msra.mxu0 %v1027_v34 }
  0xcf   :  { %161 = vmatmul.f32.gmra.mxu2 %v953_v21  ;;  %456 = vmatpush.msra.mxu0 %v1034_v35  ;;  %v1277_v21 = vld [vmem:[%s1402_s0 + $0x8] sm:$0xff] }
  0xd0   :  { %765 = vmatmul.msk.f32.gmra.mxu0 %vm314_vm1, %v1277_v21 }
  0xd1   :  { %457 = vmatpush.msra.mxu0 %v1040_v36 }
  0xd3   :  { %458 = vmatpush.msra.mxu0 %v1045_v37  ;;  %v254_v34 = vpop.f32.mrf.mxu1 }
  0xd5   :  { %459 = vmatpush.msra.mxu0 %v1051_v38 }
  0xd7   :  { %164 = vmatmul.f32.gmra.mxu2 %v959_v22  ;;  %v775_v22 = vld [vmem:[%s1400_s3 + $0x78] sm:$0xff]  ;;  %460 = vmatpush.msra.mxu0 %v1057_v39 }
  0xd8   :  { %461 = vmatmul.f32.vlgmr.msra.gmra.mxu0 %v1242_v14 }
  0xdb   :  { %v257_v35 = vpop.f32.mrf.mxu1 }
  0xdf   :  { %360 = vmatmul.f32.vlgmr.msra.gmra.mxu2 %v1242_v14 }
  0xe0   :  { %464 = vmatmul.f32.gmra.mxu0 %v1264_v19 }
  0xe7   :  { %363 = vmatmul.f32.gmra.mxu2 %v1264_v19 }
 0x122   :  { %v1197_v0 = vpop.f32.mrf.mxu2 }
 0x123   :  { %v497_v2 = vmul.f32 -9.184851e-17, %v1197_v0  ;;  %v659_v5 = vmul.f32 0.0, %v1197_v0 }
 0x12a   :  { %v1208_v4 = vpop.f32.mrf.mxu2 }
 0x12b   :  { %v498_v6 = vmul.f32 -9.184851e-17, %v1208_v4  ;;  %v660_v9 = vmul.f32 0.0, %v1208_v4 }
 0x132   :  { %v1225_v10 = vpop.f32.mrf.mxu2 }
 0x133   :  { %v499_v11 = vmul.f32 -9.184851e-17, %v1225_v10  ;;  %v661_v12 = vmul.f32 0.0, %v1225_v10 }
 0x13a   :  { %v1236_v13 = vpop.f32.mrf.mxu2 }
 0x13b   :  { %v662_v15 = vmul.f32 0.0, %v1236_v13  ;;  %v500_v16 = vmul.f32 -9.184851e-17, %v1236_v13 }
 0x13d   :  { %v338_v37 = vpop.f32.mrf.mxu0 }
 0x142   :  { %v156_v17 = vpop.f32.mrf.mxu2 }
 0x143   :  { %736 = vmatmul.msk.f32.vlgmr.msra.gmra.mxu3 %vm80_vm0, %v156_v17 }
 0x144   :  { %430 = vmatpush.msra.mxu3 %v775_v22 }
 0x146   :  { %431 = vmatpush.msra.mxu3 %v774_v24 }
 0x148   :  { %432 = vmatpush.msra.mxu3 %v773_v25 }
 0x14a   :  { %v159_v20 = vpop.f32.mrf.mxu2  ;;  %433 = vmatpush.msra.mxu3 %v772_v26 }
 0x14b   :  { %737 = vmatmul.msk.f32.gmra.mxu3 %vm80_vm0, %v159_v20 }
 0x14c   :  { %434 = vmatpush.msra.mxu3 %v771_v29 }
 0x14d   :  { %v341_v40 = vpop.f32.mrf.mxu0 }
 0x14e   :  { %435 = vmatpush.msra.mxu3 %v770_v30 }
 0x150   :  { %436 = vmatpush.msra.mxu3 %v769_v31 }
 0x152   :  { %v162_v23 = vpop.f32.mrf.mxu2  ;;  %437 = vmatpush.msra.mxu3 %v768_v32 }
 0x153   :  { %738 = vmatmul.msk.f32.gmra.mxu3 %vm80_vm0, %v162_v23 }
 0x155   :  { %v462_v47 = vpop.f32.mrf.mxu0 }
 0x15a   :  { %v165_v27 = vpop.f32.mrf.mxu2 }
 0x15b   :  { %739 = vmatmul.msk.f32.gmra.mxu3 %vm80_vm0, %v165_v27 }
 0x15d   :  { %v465_v60 = vpop.f32.mrf.mxu0 }
 0x15e   :  { %488 = vmatpush.msrb.mxu2 %v465_v60 }
 0x160   :  { %489 = vmatpush.msrb.mxu2 %v462_v47 }
 0x162   :  { %v361_v36 = vpop.f32.mrf.mxu2 }
 0x163   :  { %760 = vmatmul.msk.f32.vlgmr.msrb.gmra.mxu3 %vm80_vm0, %v248_v28 }
 0x16a   :  { %v364_v39 = vpop.f32.mrf.mxu2 }
 0x16b   :  { %761 = vmatmul.msk.f32.gmra.mxu3 %vm80_vm0, %v251_v33  ;;  %388 = vmatpush.msrb.mxu1 %v364_v39 }
 0x16d   :  { %389 = vmatpush.msrb.mxu1 %v361_v36 }
 0x16e   :  { %766 = vmatmul.msk.f32.vlgmr.msrb.gmra.mxu1 %vm367_vm2, %v338_v37 }
 0x173   :  { %762 = vmatmul.msk.f32.gmra.mxu3 %vm80_vm0, %v254_v34 }
 0x176   :  { %767 = vmatmul.msk.f32.gmra.mxu1 %vm367_vm2, %v341_v40 }
 0x17b   :  { %763 = vmatmul.msk.f32.gmra.mxu3 %vm80_vm0, %v257_v35 }
 0x183   :  { %776 = vmatmul.msk.f32.vlgmr.msra.gmra.mxu3 %vm314_vm1, %v1259_v18 }
 0x18b   :  { %777 = vmatmul.msk.f32.gmra.mxu3 %vm314_vm1, %v1277_v21 }
 0x1c6   :  { %v202_v38 = vpop.f32.mrf.mxu3 }
 0x1c7   :  { %v501_v22 = vmul.f32 2.0, %v202_v38  ;;  %v663_v35 = vmul.f32 3.633736e-17, %v202_v38 }
 0x1ce   :  { %v205_v42 = vpop.f32.mrf.mxu3 }
 0x1cf   :  { %v502_v23 = vmul.f32 2.0, %v205_v42  ;;  %v664_v26 = vmul.f32 3.633736e-17, %v205_v42  ;;  %v398_v36 = vmul.f32 -9.184851e-17, %v205_v42 }
 0x1d1   :  { %v402_v42 = vadd.f32 %v398_v36, %v1208_v4 }
 0x1d6   :  { %v208_v52 = vpop.f32.mrf.mxu3 }
 0x1d7   :  { %v399_v17 = vmul.f32 -9.184851e-17, %v208_v52  ;;  %v665_v20 = vmul.f32 3.633736e-17, %v208_v52  ;;  %v503_v24 = vmul.f32 2.0, %v208_v52 }
 0x1d9   :  { %v403_v37 = vadd.f32 %v399_v17, %v1225_v10  ;;  %v669_v39 = vadd.f32 %v665_v20, %v661_v12  ;;  %v507_v40 = vadd.f32 %v503_v24, %v499_v11  ;;  %v667_v10 = vadd.f32 %v663_v35, %v659_v5 }
 0x1da   :  { %v505_v11 = vadd.f32 %v501_v22, %v497_v2 }
 0x1de   :  { %v211_v61 = vpop.f32.mrf.mxu3 }
 0x1df   :  { %v666_v3 = vmul.f32 3.633736e-17, %v211_v61  ;;  %v400_v7 = vmul.f32 -9.184851e-17, %v211_v61  ;;  %v504_v8 = vmul.f32 2.0, %v211_v61 }
 0x1e0   :  { %v397_v61 = vmul.f32 -9.184851e-17, %v202_v38 }
 0x1e1   :  { %v670_v25 = vadd.f32 %v666_v3, %v662_v15  ;;  %v404_v27 = vadd.f32 %v400_v7, %v1236_v13  ;;  %v508_v28 = vadd.f32 %v504_v8, %v500_v16  ;;  %v668_v13 = vadd.f32 %v664_v26, %v660_v9 }
 0x1e2   :  { %v506_v8 = vadd.f32 %v502_v23, %v498_v6  ;;  %v401_v38 = vadd.f32 %v397_v61, %v1197_v0 }
 0x1e6   :  { %v294_v62 = vpop.f32.mrf.mxu3 }
 0x1e7   :  { %v509_v15 = vmul.f32 3.633736e-17, %v294_v62  ;;  %v671_v9 = vadd.f32 %v667_v10, %v294_v62 }
 0x1e9   :  { %v513_v20 = vadd.f32 %v509_v15, %v505_v11 }
 0x1ee   :  { %v297_v63 = vpop.f32.mrf.mxu3 }
 0x1ef   :  { %v510_v47 = vmul.f32 3.633736e-17, %v297_v63  ;;  %v406_v3 = vmul.f32 0.0, %v297_v63  ;;  %v672_v12 = vadd.f32 %v668_v13, %v297_v63 }
 0x1f1   :  { %v514_v17 = vadd.f32 %v510_v47, %v506_v8  ;;  %v410_v6 = vadd.f32 %v406_v3, %v402_v42 }
 0x1f6   :  { %v300_v1 = vpop.f32.mrf.mxu3 }
 0x1f7   :  { %v407_v29 = vmul.f32 0.0, %v300_v1  ;;  %v511_v31 = vmul.f32 3.633736e-17, %v300_v1  ;;  %v673_v7 = vadd.f32 %v669_v39, %v300_v1 }
 0x1f9   :  { %v515_v16 = vadd.f32 %v511_v31, %v507_v40 }
 0x1fe   :  { %v303_v30 = vpop.f32.mrf.mxu3 }
 0x1ff   :  { %v408_v32 = vmul.f32 0.0, %v303_v30  ;;  %v512_v33 = vmul.f32 3.633736e-17, %v303_v30  ;;  %v674_v34 = vadd.f32 %v670_v25, %v303_v30  ;;  %v411_v25 = vadd.f32 %v407_v29, %v403_v37 }
 0x200   :  { %v405_v30 = vmul.f32 0.0, %v294_v62 }
 0x201   :  { %v412_v60 = vadd.f32 %v408_v32, %v404_v27  ;;  %v516_v52 = vadd.f32 %v512_v33, %v508_v28  ;;  %693 = vmatpush.msrb.mxu0 %v674_v34 }
 0x202   :  { %v409_v4 = vadd.f32 %v405_v30, %v401_v38 }
 0x203   :  { %535 = vmatpush.msra.mxu1 %v516_v52  ;;  %564 = vmatpush.msrb.mxu3 %v412_v60 }
 0x204   :  { %694 = vmatpush.msrb.mxu0 %v673_v7 }
 0x205   :  { %536 = vmatpush.msra.mxu1 %v515_v16  ;;  %565 = vmatpush.msrb.mxu3 %v411_v25 }
 0x206   :  { %695 = vmatpush.msrb.mxu0 %v672_v12  ;;  %v439_v1 = vpop.f32.mrf.mxu3 }
 0x207   :  { %778 = vmatmul.msk.f32.vlgmr.msrb.gmra.mxu2 %vm367_vm2, %v439_v1  ;;  %537 = vmatpush.msra.mxu1 %v514_v17 }
 0x208   :  { %566 = vmatpush.msrb.mxu3 %v410_v6  ;;  %696 = vmatpush.msrb.mxu0 %v671_v9 }
 0x209   :  { %538 = vmatpush.msra.mxu1 %v513_v20 }
 0x20a   :  { %567 = vmatpush.msrb.mxu3 %v409_v4 }
 0x20b   :  { %607 = vmatpush.msrb.mxu1 %v1065_v41  ;;  %v391_v41 = vpop.f32.mrf.mxu1 }
 0x20c   :  { %782 = vmatmul.msk.f32.vlgmr.msrb.gmra.mxu3 %vm80_vm0, %v391_v41 }
 0x20d   :  { %608 = vmatpush.msrb.mxu1 %v1076_v43 }
 0x20e   :  { %v442_v63 = vpop.f32.mrf.mxu3 }
 0x20f   :  { %609 = vmatpush.msrb.mxu1 %v1081_v44  ;;  %779 = vmatmul.msk.f32.gmra.mxu2 %vm367_vm2, %v442_v63  ;;  %v791_v44 = vld [vmem:[%s1400_s3 + $0xb8] sm:$0xff] }
 0x210   :  { %592 = vmatpush.msra.mxu2 %v791_v44 }
 0x211   :  { %610 = vmatpush.msrb.mxu1 %v1088_v45  ;;  %v790_v45 = vld [vmem:[%s1400_s3 + $0xb0] sm:$0xff] }
 0x212   :  { %593 = vmatpush.msra.mxu2 %v790_v45 }
 0x213   :  { %611 = vmatpush.msrb.mxu1 %v1095_v46  ;;  %v394_v43 = vpop.f32.mrf.mxu1  ;;  %v789_v46 = vld [vmem:[%s1400_s3 + $0xa8] sm:$0xff] }
 0x214   :  { %783 = vmatmul.msk.f32.gmra.mxu3 %vm80_vm0, %v394_v43  ;;  %594 = vmatpush.msra.mxu2 %v789_v46 }
 0x215   :  { %612 = vmatpush.msrb.mxu1 %v1105_v48  ;;  %v788_v48 = vld [vmem:[%s1400_s3 + $0xa0] sm:$0xff] }
 0x216   :  { %595 = vmatpush.msra.mxu2 %v788_v48 }
 0x217   :  { %613 = vmatpush.msrb.mxu1 %v1110_v49  ;;  %v787_v49 = vld [vmem:[%s1400_s3 + $0x98] sm:$0xff] }
 0x218   :  { %596 = vmatpush.msra.mxu2 %v787_v49 }
 0x219   :  { %614 = vmatpush.msrb.mxu1 %v1117_v50  ;;  %v786_v50 = vld [vmem:[%s1400_s3 + $0x90] sm:$0xff] }
 0x21a   :  { %597 = vmatpush.msra.mxu2 %v786_v50 }
 0x21b   :  { %615 = vmatpush.msrb.mxu1 %v1124_v51  ;;  %v785_v51 = vld [vmem:[%s1400_s3 + $0x88] sm:$0xff] }
 0x21c   :  { %598 = vmatpush.msra.mxu2 %v785_v51 }
 0x21d   :  { %616 = vmatpush.msrb.mxu1 %v1134_v53  ;;  %v784_v53 = vld [vmem:[%s1400_s3 + $0x80] sm:$0xff] }
 0x21e   :  { %599 = vmatpush.msra.mxu2 %v784_v53 }
 0x21f   :  { %617 = vmatpush.msrb.mxu1 %v1139_v54  ;;  %792 = vmatmul.msk.f32.vlgmr.msra.gmra.mxu2 %vm314_vm1, %v1259_v18 }
 0x221   :  { %618 = vmatpush.msrb.mxu1 %v1146_v55 }
 0x223   :  { %619 = vmatpush.msrb.mxu1 %v1153_v56 }
 0x225   :  { %620 = vmatpush.msrb.mxu1 %v1160_v57 }
 0x227   :  { %621 = vmatpush.msrb.mxu1 %v1168_v58  ;;  %793 = vmatmul.msk.f32.gmra.mxu2 %vm314_vm1, %v1277_v21 }
 0x229   :  { %622 = vmatpush.msrb.mxu1 %v1174_v59 }
 0x28a   :  { %v491_v54 = vpop.f32.mrf.mxu2 }
 0x28b   :  { %780 = vmatmul.msk.f32.vlgmr.msra.gmra.mxu1 %vm80_vm0, %v491_v54 }
 0x28f   :  { %v569_v56 = vpop.f32.mrf.mxu3 }
 0x292   :  { %v494_v55 = vpop.f32.mrf.mxu2 }
 0x293   :  { %781 = vmatmul.msk.f32.gmra.mxu1 %vm80_vm0, %v494_v55 }
 0x297   :  { %v572_v2 = vpop.f32.mrf.mxu3 }
 0x29b   :  { %623 = vmatmul.f32.vlgmr.msrb.gmra.mxu1 %v1242_v14 }
 0x2a2   :  { %v601_v62 = vpop.f32.mrf.mxu2 }
 0x2a3   :  { %626 = vmatmul.f32.gmra.mxu1 %v1264_v19 }
 0x2aa   :  { %v604_v21 = vpop.f32.mrf.mxu2 }
 0x308   :  { %v540_v57 = vpop.f32.mrf.mxu1 }
 0x309   :  { %v570_v58 = vadd.f32 %v569_v56, %v540_v57 }
 0x310   :  { %v543_v59 = vpop.f32.mrf.mxu1 }
 0x311   :  { %v573_v23 = vadd.f32 %v572_v2, %v543_v59 }
 0x318   :  { %v624_v0 = vpop.f32.mrf.mxu1 }
 0x320   :  { %v627_v18 = vpop.f32.mrf.mxu1 }
 0x321   :  { %650 = vmatpush.msra.mxu3 %v627_v18 }
 0x323   :  { %651 = vmatpush.msra.mxu3 %v624_v0 }
 0x324   :  { %794 = vmatmul.msk.f32.vlgmr.msra.gmra.mxu3 %vm367_vm2, %v601_v62 }
 0x32c   :  { %795 = vmatmul.msk.f32.gmra.mxu3 %vm367_vm2, %v604_v21 }
 0x3a7   :  { %v653_v5 = vpop.f32.mrf.mxu3 }
 0x3a8   :  { %796 = vmatmul.msk.f32.vlgmr.msrb.gmra.mxu0 %vm80_vm0, %v653_v5 }
 0x3af   :  { %v656_v14 = vpop.f32.mrf.mxu3 }
 0x3b0   :  { %797 = vmatmul.msk.f32.gmra.mxu0 %vm80_vm0, %v656_v14 }
 0x425   :  { %v698_v19 = vpop.f32.mrf.mxu0 }
 0x426   :  { %v704_v22 = vadd.f32 %v698_v19, %v570_v58 }
 0x428   :  { %706 = vst [vmem:[%s1403_s6] sm:$0xff] %v704_v22 }
 0x42d   :  { %v701_v24 = vpop.f32.mrf.mxu0 }
 0x42e   :  { %v705_v26 = vadd.f32 %v701_v24, %v573_v23 }
 0x430   :  { %707 = vst [vmem:[%s1403_s6 + $0x8] sm:$0xff] %v705_v26 }

</bundles_post_ra>
